<compile_context>
chip_gen: v7x
topology: tpu7x:2x2x1
jax: 0.10.0
libtpu: 0.0.40
codegen_flags: <defaults>
</compile_context>

<pallas_src>
import functools

import jax
import jax.numpy as jnp
from jax.experimental import pallas as pl
from jax.experimental.pallas import tpu as pltpu

_LANES = 128


def _affine_kernel(x_ref, w_ref, b_ref, o_ref):
    # One MXU matmul per grid step; bias added on the f32 accumulator.
    acc = jnp.dot(x_ref[...], w_ref[...], preferred_element_type=jnp.float32)
    o_ref[...] = (acc + b_ref[...]).astype(o_ref.dtype)


def prepare_params(w1, b1, w2, b2, w3, b3, *, compute_dtype=jnp.bfloat16):
    """One-time (per weight set) collapse of the 3 activation-free Linears into
    a single packed affine map.  Collapse + kron are done in f32; only the
    final packed weight is cast to `compute_dtype`.  Bias stays f32 (tiny, and
    it is added on the f32 accumulator inside the kernel)."""
    out_dim = w3.shape[1]
    pack = _LANES // out_dim if (out_dim <= _LANES and _LANES % out_dim == 0) else 1

    f32 = jnp.float32
    w1f, w2f, w3f = w1.astype(f32), w2.astype(f32), w3.astype(f32)
    b1f, b2f, b3f = b1.astype(f32), b2.astype(f32), b3.astype(f32)
    w = w1f @ w2f @ w3f                      # [in, out]
    b = b1f @ w2f @ w3f + b2f @ w3f + b3f    # [1, out]
    if pack > 1:
        w = jnp.kron(jnp.eye(pack, dtype=f32), w)   # [pack*in, pack*out]
        b = jnp.tile(b, (1, pack))                  # [1, pack*out]
    return w.astype(compute_dtype), b, pack


def _choose_block_rows(rows, packed_in, packed_out, itemsize):
    """Trace-time (static-shape) tile heuristic."""
    # Small problem: one grid step. Splitting costs ~0.35us/step, and a v7x
    # 2-TC split only pays off once each core gets >=1-2 MiB of DMA work.
    total_bytes = rows * (packed_in + packed_out) * itemsize
    if total_bytes <= (2 << 20):
        return rows
    # Large problem: big tiles (<=4096 rows) to amortize per-step overhead,
    # bounded so double-buffered x+out tiles stay well inside every chip's
    # VMEM budget (v7x 64 MiB physical, v5e 16 MiB default scoped; we request
    # 32 MiB explicitly below).
    per_row_bytes = (packed_in + packed_out) * itemsize * 2   # x+out, double-buffered
    br = min(4096, rows, (16 << 20) // per_row_bytes)
    br = max(16, (br // 16) * 16)             # sublane-friendly for bf16 and f32
    n_blocks = pl.cdiv(rows, br)
    if n_blocks > 1 and n_blocks % 2 == 1:    # even step count -> both v7x TCs loaded
        br = max(16, -(-pl.cdiv(rows, n_blocks + 1) // 16) * 16)
    return min(br, rows)


@functools.partial(jax.jit, static_argnames=("out_dim", "pack", "block_rows"))
def mlp_forward(x, w_p, b_p, *, out_dim, pack, block_rows=None):
    """Forward pass of NN using the pre-packed affine map from prepare_params."""
    B, in_dim = x.shape
    cdtype = w_p.dtype

    padded_b = -(-B // pack) * pack
    if padded_b != B:
        # Fallback only for pack-misaligned batches (adds one extra pass over x).
        # TODO(synk): replace with an in-kernel masked last block.
        x = jnp.pad(x, ((0, padded_b - B), (0, 0)))
    rows = padded_b // pack
    packed_in = pack * in_dim
    packed_out = pack * out_dim

    # Cast to the compute dtype (no-op if x already matches) and fold `pack`
    # batch rows into one lane-dense row (pure row-major view, no data motion).
    x_p = x.astype(cdtype).reshape(rows, packed_in)

    if block_rows is None:
        br = _choose_block_rows(rows, packed_in, packed_out, jnp.dtype(cdtype).itemsize)
    else:
        br = block_rows
    br = min(br, rows)
    n_blocks = pl.cdiv(rows, br)

    out_packed = pl.pallas_call(
        _affine_kernel,
        out_shape=jax.ShapeDtypeStruct((rows, packed_out), cdtype),
        grid_spec=pltpu.PrefetchScalarGridSpec(
            num_scalar_prefetch=0,
            grid=(n_blocks,),
            in_specs=[
                pl.BlockSpec((br, packed_in), lambda i: (i, 0)),           # x tile
                pl.BlockSpec((packed_in, packed_out), lambda i: (0, 0)),   # packed W
                pl.BlockSpec((1, packed_out), lambda i: (0, 0)),           # packed b (f32)
            ],
            out_specs=pl.BlockSpec((br, packed_out), lambda i: (i, 0)),
        ),
        compiler_params=pltpu.CompilerParams(
            dimension_semantics=("parallel",),
            vmem_limit_bytes=32 << 20,   # safe on v5e/v6e/v7x, above v5e's 16 MiB default
        ),
    )(x_p, w_p, b_p)

    # Undo the lane packing (row-major reshape) and drop any batch padding.
    return out_packed.reshape(padded_b, out_dim)[:B]


def init_linear(key, in_features, out_features, dtype=jnp.float32):
    """Deterministic init mirroring nn.Linear (uniform +/- 1/sqrt(in_features)).
    Returns W already transposed to [in_features, out_features], b as [1, out]."""
    kw, kb = jax.random.split(key)
    bound = 1.0 / jnp.sqrt(jnp.asarray(in_features, dtype))
    w = jax.random.uniform(kw, (in_features, out_features), dtype, -bound, bound)
    b = jax.random.uniform(kb, (1, out_features), dtype, -bound, bound)
    return w, b


if __name__ == "__main__":
    input_dim, hidden_dim, output_dim = 32, 64, 16
    batch = 512   # pack-aligned (512 % 8 == 0) -> no padding copy

    root = jax.random.PRNGKey(0)
    kx, k1, k2, k3 = jax.random.split(root, 4)

    x = jax.random.normal(kx, (batch, input_dim), jnp.float32)
    w1, b1 = init_linear(k1, input_dim, hidden_dim)
    w2, b2 = init_linear(k2, hidden_dim, hidden_dim)
    w3, b3 = init_linear(k3, hidden_dim, output_dim)

    # Pure-JAX reference (original 3-matmul forward).
    ref = ((x @ w1 + b1) @ w2 + b2) @ w3 + b3

    # f32 path: tight correctness check of the collapsed-affine kernel
    # (collapse only changes rounding order).
    w_p32, b_p32, pack = prepare_params(w1, b1, w2, b2, w3, b3,
                                        compute_dtype=jnp.float32)
    out_f32 = jax.block_until_ready(
        mlp_forward(x, w_p32, b_p32, out_dim=output_dim, pack=pack))
    assert out_f32.shape == (batch, output_dim)
    assert jnp.allclose(out_f32, ref, atol=1e-4, rtol=1e-4)

    # bf16 I/O path (halves HBM traffic on this memory-bound kernel);
    # looser tolerance for bf16 quantization of x and the packed weight.
    w_pbf, b_pbf, pack = prepare_params(w1, b1, w2, b2, w3, b3,
                                        compute_dtype=jnp.bfloat16)
    out_bf16 = jax.block_until_ready(
        mlp_forward(x, w_pbf, b_pbf, out_dim=output_dim, pack=pack))
    assert out_bf16.shape == (batch, output_dim)
    assert jnp.allclose(out_bf16.astype(jnp.float32), ref, atol=5e-2, rtol=5e-2)

    print("KERNEL_OK")
</pallas_src>

<mosaic_0001>
module attributes {stable_mosaic.version = 11 : i64} {
  func.func @_affine_kernel(%arg0: i32, %arg1: memref<64x256xf32, #tpu.memory_space<vmem>>, %arg2: memref<256x128xf32, #tpu.memory_space<vmem>>, %arg3: memref<1x128xf32, #tpu.memory_space<vmem>>, %arg4: memref<64x128xf32, #tpu.memory_space<vmem>>) attributes {dimension_semantics = [#tpu.dimension_semantics<parallel>], iteration_bounds = array<i64: 1>, scalar_prefetch = 0 : i64, scratch_operands = 0 : i64, tpu.core_type = #tpu.core_type<tc>, window_params = [{transform_indices = @transform_0, window_bounds = array<i64: 64, 256>}, {pipeline_mode = #tpu.pipeline_mode<synchronous>, transform_indices = @transform_1, window_bounds = array<i64: 256, 128>}, {pipeline_mode = #tpu.pipeline_mode<synchronous>, transform_indices = @transform_2, window_bounds = array<i64: 1, 128>}, {transform_indices = @transform_3, window_bounds = array<i64: 64, 128>}]} {
    %c0 = arith.constant 0 : index
    %c0_0 = arith.constant 0 : index
    %0 = vector.load %arg1[%c0, %c0_0] : memref<64x256xf32, #tpu.memory_space<vmem>>, vector<64x256xf32>
    %c0_1 = arith.constant 0 : index
    %c0_2 = arith.constant 0 : index
    %1 = vector.load %arg2[%c0_1, %c0_2] : memref<256x128xf32, #tpu.memory_space<vmem>>, vector<256x128xf32>
    %cst = arith.constant dense<0.000000e+00> : vector<64x128xf32>
    %2 = tpu.matmul %0, %1, %cst {dimension_numbers = #tpu.dot_dimension_numbers<[1], [0], [0], [1], [0, 0, 1, 1], [], []>} : vector<64x256xf32>, vector<256x128xf32>, vector<64x128xf32> -> vector<64x128xf32>
    %c0_3 = arith.constant 0 : index
    %c0_4 = arith.constant 0 : index
    %3 = vector.load %arg3[%c0_3, %c0_4] : memref<1x128xf32, #tpu.memory_space<vmem>>, vector<1x128xf32>
    %4 = vector.broadcast %3 : vector<1x128xf32> to vector<64x128xf32>
    %5 = arith.addf %2, %4 : vector<64x128xf32>
    %c0_5 = arith.constant 0 : index
    %c0_6 = arith.constant 0 : index
    %6 = vector.load %arg4[%c0_5, %c0_6] : memref<64x128xf32, #tpu.memory_space<vmem>>, vector<64x128xf32>
    tpu.vector_store %arg4[%c0_5, %c0_6], %5 {strides = array<i32>} : memref<64x128xf32, #tpu.memory_space<vmem>>, vector<64x128xf32>,
    return
  }
  func.func @transform_0(%arg0: i32) -> (i32, i32) {
    %c0_i32 = arith.constant 0 : i32
    %c0_i32_0 = arith.constant 0 : i32
    return %arg0, %c0_i32 : i32, i32
  }
  func.func @transform_1(%arg0: i32) -> (i32, i32) {
    %c0_i32 = arith.constant 0 : i32
    %c0_i32_0 = arith.constant 0 : i32
    %c0_i32_1 = arith.constant 0 : i32
    return %c0_i32, %c0_i32_0 : i32, i32
  }
  func.func @transform_2(%arg0: i32) -> (i32, i32) {
    %c0_i32 = arith.constant 0 : i32
    %c0_i32_0 = arith.constant 0 : i32
    %c0_i32_1 = arith.constant 0 : i32
    return %c0_i32, %c0_i32_0 : i32, i32
  }
  func.func @transform_3(%arg0: i32) -> (i32, i32) {
    %c0_i32 = arith.constant 0 : i32
    %c0_i32_0 = arith.constant 0 : i32
    return %arg0, %c0_i32 : i32, i32
  }
}

</mosaic_0001>

<bundles_post_ra>
// kernel: mlp_forward.1
= control target key start
LH: loop header
LB: loop body
LE: loop exit
PB: predicated region body
PF: predicated region fallthrough
CT: control target
= control target key end

     0   :  { %s482_s1 = inlined_call_operand.vmem [shape: f32[256,128], index: 1, kind: input, shape index: {}]   ;;  %s483_s0 = inlined_call_operand.vmem [shape: f32[64,256], index: 0, kind: input, shape index: {}]   ;;  %s484_s2 = inlined_call_operand.vmem [shape: f32[1,128], index: 2, kind: input, shape index: {}]   ;;  %s485_s3 = inlined_call_operand.vmem [shape: f32[64,128], index: 3, kind: output, shape index: {}]  }
   0x1   :  { %v46_v0 = vld [vmem:[%s482_s1 + $0x80] sm:$0xff]  ;;  %v47_v1 = vld [vmem:[%s482_s1 + $0x88] sm:$0xff]  ;;  %v48_v5 = vld [vmem:[%s482_s1 + $0x90] sm:$0xff] }
   0x2   :  { %v30_v2 = vld [vmem:[%s482_s1] sm:$0xff]  ;;  %v243_v3 = vpack.c.bf16 %v47_v1, %v46_v0  ;;  %v31_v4 = vld [vmem:[%s482_s1 + $0x8] sm:$0xff]  ;;  %v49_v6 = vld [vmem:[%s482_s1 + $0x98] sm:$0xff] }
   0x3   :  { %v245_v7 = vpack.c.bf16 %v31_v4, %v30_v2  ;;  %v247_v8 = vpack.c.bf16 %v49_v6, %v48_v5  ;;  %v32_v9 = vld [vmem:[%s482_s1 + $0x10] sm:$0xff]  ;;  %v33_v10 = vld [vmem:[%s482_s1 + $0x18] sm:$0xff]  ;;  %v50_v11 = vld [vmem:[%s482_s1 + $0xa0] sm:$0xff] }
   0x4   :  { %244 = vmatprep.subr.bf16.mxu0 %v243_v3  ;;  %275 = vmatprep.subr.bf16.mxu1 %v243_v3  ;;  %v51_v12 = vld [vmem:[%s482_s1 + $0xa8] sm:$0xff]  ;;  %v249_v13 = vpack.c.bf16 %v33_v10, %v32_v9  ;;  %v34_v15 = vld [vmem:[%s482_s1 + $0x20] sm:$0xff]  ;;  %v52_v17 = vld [vmem:[%s482_s1 + $0xb0] sm:$0xff] }
   0x5   :  { %246 = vmatpush3.bf16.msra.mxu0 %v245_v7  ;;  %283 = vmatpush3.bf16.msra.mxu1 %v245_v7  ;;  %v251_v14 = vpack.c.bf16 %v51_v12, %v50_v11  ;;  %v35_v16 = vld [vmem:[%s482_s1 + $0x28] sm:$0xff]  ;;  %v53_v18 = vld [vmem:[%s482_s1 + $0xb8] sm:$0xff]  ;;  %v36_v21 = vld [vmem:[%s482_s1 + $0x30] sm:$0xff] }
   0x6   :  { %248 = vmatprep.subr.bf16.mxu0 %v247_v8  ;;  %276 = vmatprep.subr.bf16.mxu1 %v247_v8  ;;  %v253_v19 = vpack.c.bf16 %v35_v16, %v34_v15  ;;  %v255_v20 = vpack.c.bf16 %v53_v18, %v52_v17  ;;  %v37_v22 = vld [vmem:[%s482_s1 + $0x38] sm:$0xff]  ;;  %v54_v23 = vld [vmem:[%s482_s1 + $0xc0] sm:$0xff]  ;;  %v55_v24 = vld [vmem:[%s482_s1 + $0xc8] sm:$0xff] }
   0x7   :  { %v15_v25 = vld [vmem:[%s483_s0 + $0x8] sm:$0xff]  ;;  %v257_v27 = vpack.c.bf16 %v37_v22, %v36_v21  ;;  %v259_v28 = vpack.c.bf16 %v55_v24, %v54_v23  ;;  %v38_v29 = vld [vmem:[%s482_s1 + $0x40] sm:$0xff]  ;;  %v56_v31 = vld [vmem:[%s482_s1 + $0xd0] sm:$0xff] }
   0x8   :  { %133 = vmatprep.mubr.f32.mxu0 %v15_v25  ;;  %v23_v26 = vld [vmem:[%s483_s0 + $0x48] sm:$0xff]  ;;  %v57_v32 = vld [vmem:[%s482_s1 + $0xd8] sm:$0xff]  ;;  %v40_v35 = vld [vmem:[%s482_s1 + $0x50] sm:$0xff] }
   0x9   :  { %250 = vmatpush3.bf16.msra.mxu0 %v249_v13  ;;  %284 = vmatpush3.bf16.msra.mxu1 %v249_v13  ;;  %v39_v30 = vld [vmem:[%s482_s1 + $0x48] sm:$0xff]  ;;  %v263_v34 = vpack.c.bf16 %v57_v32, %v56_v31  ;;  %v41_v36 = vld [vmem:[%s482_s1 + $0x58] sm:$0xff]  ;;  %v58_v37 = vld [vmem:[%s482_s1 + $0xe0] sm:$0xff] }
   0xa   :  { %252 = vmatprep.subr.bf16.mxu0 %v251_v14  ;;  %277 = vmatprep.subr.bf16.mxu1 %v251_v14  ;;  %v261_v33 = vpack.c.bf16 %v39_v30, %v38_v29  ;;  %v59_v38 = vld [vmem:[%s482_s1 + $0xe8] sm:$0xff]  ;;  %v265_v39 = vpack.c.bf16 %v41_v36, %v40_v35  ;;  %v42_v41 = vld [vmem:[%s482_s1 + $0x60] sm:$0xff]  ;;  %v60_v43 = vld [vmem:[%s482_s1 + $0xf0] sm:$0xff] }
   0xb   :  { %153 = vmatprep.mubr.f32.mxu1 %v23_v26  ;;  %v267_v40 = vpack.c.bf16 %v59_v38, %v58_v37  ;;  %v43_v42 = vld [vmem:[%s482_s1 + $0x68] sm:$0xff]  ;;  %v61_v44 = vld [vmem:[%s482_s1 + $0xf8] sm:$0xff]  ;;  %v44_v47 = vld [vmem:[%s482_s1 + $0x70] sm:$0xff] }
   0xc   :  { %v269_v45 = vpack.c.bf16 %v43_v42, %v42_v41  ;;  %v271_v46 = vpack.c.bf16 %v61_v44, %v60_v43  ;;  %v45_v48 = vld [vmem:[%s482_s1 + $0x78] sm:$0xff]  ;;  %v14_v50 = vld [vmem:[%s483_s0] sm:$0xff]  ;;  %v16_v54 = vld [vmem:[%s483_s0 + $0x10] sm:$0xff] }
   0xd   :  { %254 = vmatpush3.bf16.msra.mxu0 %v253_v19  ;;  %285 = vmatpush3.bf16.msra.mxu1 %v253_v19  ;;  %v273_v49 = vpack.c.bf16 %v45_v48, %v44_v47  ;;  %v22_v51 = vld [vmem:[%s483_s0 + $0x40] sm:$0xff]  ;;  %v17_v52 = vld [vmem:[%s483_s0 + $0x18] sm:$0xff]  ;;  %v24_v55 = vld [vmem:[%s483_s0 + $0x50] sm:$0xff] }
   0xe   :  { %256 = vmatprep.subr.bf16.mxu0 %v255_v20  ;;  %278 = vmatprep.subr.bf16.mxu1 %v255_v20  ;;  %v25_v53 = vld [vmem:[%s483_s0 + $0x58] sm:$0xff]  ;;  %v19_v56 = vld [vmem:[%s483_s0 + $0x28] sm:$0xff]  ;;  %v18_v58 = vld [vmem:[%s483_s0 + $0x20] sm:$0xff] }
   0xf   :  { %v27_v57 = vld [vmem:[%s483_s0 + $0x68] sm:$0xff]  ;;  %v26_v59 = vld [vmem:[%s483_s0 + $0x60] sm:$0xff]  ;;  %v21_v60 = vld [vmem:[%s483_s0 + $0x38] sm:$0xff] }
  0x10   :  { %v29_v61 = vld [vmem:[%s483_s0 + $0x78] sm:$0xff]  ;;  %v20_v62 = vld [vmem:[%s483_s0 + $0x30] sm:$0xff]  ;;  %v186_v2 = vld [vmem:[%s484_s2] ss:$0 sm:$0xff] }
  0x11   :  { %258 = vmatpush3.bf16.msra.mxu0 %v257_v27  ;;  %286 = vmatpush3.bf16.msra.mxu1 %v257_v27  ;;  %v28_v63 = vld [vmem:[%s483_s0 + $0x70] sm:$0xff] }
  0x12   :  { %260 = vmatprep.subr.bf16.mxu0 %v259_v28  ;;  %279 = vmatprep.subr.bf16.mxu1 %v259_v28 }
  0x15   :  { %262 = vmatpush3.bf16.msra.mxu0 %v261_v33  ;;  %287 = vmatpush3.bf16.msra.mxu1 %v261_v33 }
  0x16   :  { %264 = vmatprep.subr.bf16.mxu0 %v263_v34  ;;  %280 = vmatprep.subr.bf16.mxu1 %v263_v34 }
  0x19   :  { %266 = vmatpush3.bf16.msra.mxu0 %v265_v39  ;;  %288 = vmatpush3.bf16.msra.mxu1 %v265_v39 }
  0x1a   :  { %268 = vmatprep.subr.bf16.mxu0 %v267_v40  ;;  %281 = vmatprep.subr.bf16.mxu1 %v267_v40 }
  0x1d   :  { %270 = vmatpush3.bf16.msra.mxu0 %v269_v45  ;;  %289 = vmatpush3.bf16.msra.mxu1 %v269_v45 }
  0x1e   :  { %272 = vmatprep.subr.bf16.mxu0 %v271_v46  ;;  %282 = vmatprep.subr.bf16.mxu1 %v271_v46 }
  0x21   :  { %274 = vmatpush3.bf16.msra.mxu0 %v273_v49  ;;  %290 = vmatpush3.bf16.msra.mxu1 %v273_v49 }
  0x24   :  { %134 = vmatmul.mubr.f32.vlgmr.msra.gmra.mrb[0].mxu0 %v14_v50  ;;  %154 = vmatmul.mubr.f32.vlgmr.msra.gmra.mrb[0].mxu1 %v22_v51 }
  0x25   :  { %138 = vmatprep.mubr.f32.mxu0 %v17_v52  ;;  %158 = vmatprep.mubr.f32.mxu1 %v25_v53 }
  0x28   :  { %139 = vmatmul.mubr.f32.gmra.mrb[2].mxu0 %v16_v54  ;;  %159 = vmatmul.mubr.f32.gmra.mrb[2].mxu1 %v24_v55 }
  0x29   :  { %143 = vmatprep.mubr.f32.mxu0 %v19_v56  ;;  %163 = vmatprep.mubr.f32.mxu1 %v27_v57 }
  0x2c   :  { %144 = vmatmul.mubr.f32.gmra.mrb[4].mxu0 %v18_v58  ;;  %164 = vmatmul.mubr.f32.gmra.mrb[4].mxu1 %v26_v59 }
  0x2d   :  { %148 = vmatprep.mubr.f32.mxu0 %v21_v60  ;;  %168 = vmatprep.mubr.f32.mxu1 %v29_v61 }
  0x30   :  { %149 = vmatmul.mubr.f32.gmra.mrb[6].mxu0 %v20_v62  ;;  %169 = vmatmul.mubr.f32.gmra.mrb[6].mxu1 %v28_v63 }
  0xf7   :  { %v219_v0 = vpop.f32.mrb[0].mxu0  ;;  %v231_v1 = vpop.f32.mrb[0].mxu1 }
  0xf8   :  { %v220_v3 = vpop.f32.mrb[1].mxu0  ;;  %v232_v4 = vpop.f32.mrb[1].mxu1 }
  0xf9   :  { %v221_v5 = vadd.f32 %v220_v3, %v219_v0  ;;  %v233_v6 = vadd.f32 %v232_v4, %v231_v1 }
  0xfb   :  { %v136_v7 = vadd.f32 %v221_v5, %v186_v2  ;;  %v156_v8 = vadd.f32 %v233_v6, %v186_v2  ;;  %v222_v9 = vpop.f32.mrb[2].mxu0  ;;  %v234_v10 = vpop.f32.mrb[2].mxu1 }
  0xfc   :  { %v223_v11 = vpop.f32.mrb[3].mxu0  ;;  %v235_v12 = vpop.f32.mrb[3].mxu1 }
  0xfd   :  { %174 = vst [vmem:[%s485_s3] sm:$0xff] %v136_v7  ;;  %178 = vst [vmem:[%s485_s3 + $0x20] sm:$0xff] %v156_v8  ;;  %v224_v13 = vadd.f32 %v223_v11, %v222_v9  ;;  %v236_v14 = vadd.f32 %v235_v12, %v234_v10 }
  0xff   :  { %v141_v15 = vadd.f32 %v224_v13, %v186_v2  ;;  %v161_v16 = vadd.f32 %v236_v14, %v186_v2  ;;  %v225_v17 = vpop.f32.mrb[4].mxu0  ;;  %v237_v18 = vpop.f32.mrb[4].mxu1 }
 0x100   :  { %v226_v19 = vpop.f32.mrb[5].mxu0  ;;  %v238_v20 = vpop.f32.mrb[5].mxu1 }
 0x101   :  { %175 = vst [vmem:[%s485_s3 + $0x8] sm:$0xff] %v141_v15  ;;  %179 = vst [vmem:[%s485_s3 + $0x28] sm:$0xff] %v161_v16  ;;  %v227_v21 = vadd.f32 %v226_v19, %v225_v17  ;;  %v239_v22 = vadd.f32 %v238_v20, %v237_v18 }
 0x103   :  { %v146_v23 = vadd.f32 %v227_v21, %v186_v2  ;;  %v166_v24 = vadd.f32 %v239_v22, %v186_v2  ;;  %v228_v25 = vpop.f32.mrb[6].mxu0  ;;  %v240_v26 = vpop.f32.mrb[6].mxu1 }
 0x104   :  { %v229_v27 = vpop.f32.mrb[7].mxu0  ;;  %v241_v28 = vpop.f32.mrb[7].mxu1 }
 0x105   :  { %176 = vst [vmem:[%s485_s3 + $0x10] sm:$0xff] %v146_v23  ;;  %180 = vst [vmem:[%s485_s3 + $0x30] sm:$0xff] %v166_v24  ;;  %v230_v29 = vadd.f32 %v229_v27, %v228_v25  ;;  %v242_v30 = vadd.f32 %v241_v28, %v240_v26 }
 0x107   :  { %v151_v31 = vadd.f32 %v230_v29, %v186_v2  ;;  %v171_v32 = vadd.f32 %v242_v30, %v186_v2 }
 0x109   :  { %177 = vst [vmem:[%s485_s3 + $0x18] sm:$0xff] %v151_v31  ;;  %181 = vst [vmem:[%s485_s3 + $0x38] sm:$0xff] %v171_v32 }

</bundles_post_ra>
